<compile_context>
chip_gen: v5e
topology: v5e:2x2
jax: 0.10.0
libtpu: 0.0.40
codegen_flags: <defaults>
</compile_context>

<pallas_src>
import math
import functools

import jax
import jax.numpy as jnp
from jax import lax
from jax.experimental import pallas as pl
from jax.experimental.pallas import tpu as pltpu


# ---------------------------------------------------------------------------
# In-kernel stateless hash PRNG (lowbias32-style avalanche)
# ---------------------------------------------------------------------------
def _hash_u32(lin_u32, seed_u32):
    h = lin_u32 ^ (seed_u32 * jnp.uint32(0x9E3779B9))
    h = (h ^ (h >> 16)) * jnp.uint32(0x7FEB352D)
    h = (h ^ (h >> 15)) * jnp.uint32(0x846CA68B)
    return h ^ (h >> 16)


# ---------------------------------------------------------------------------
# Pallas kernels
# ---------------------------------------------------------------------------
def _posenc_dropout_kernel(seed_ref, x_ref, pe_ref, o_ref, *,
                           p, tile_r, rows_per_batch, width):
    """x_ref/o_ref: (TILE_R, W) slab of one batch plane; pe_ref: (TILE_R, W).

    Computes inverted-dropout(x + pe) (training mode).
    """
    r = pl.program_id(0)            # row-tile index (outer grid axis)
    b = pl.program_id(1)            # batch index    (inner grid axis)

    y = x_ref[...].astype(jnp.float32) + pe_ref[...].astype(jnp.float32)

    # Global element index -> independent random bits per element, per batch,
    # per row-tile; deterministic for a given seed regardless of tiling/cores.
    shape = (tile_r, width)
    row = lax.broadcasted_iota(jnp.int32, shape, 0).astype(jnp.uint32)
    col = lax.broadcasted_iota(jnp.int32, shape, 1).astype(jnp.uint32)
    row_off = jnp.uint32(rows_per_batch) * b.astype(jnp.uint32) \
        + jnp.uint32(tile_r) * r.astype(jnp.uint32)
    lin = (row_off + row) * jnp.uint32(width) + col

    seed_u = seed_ref[0].astype(jnp.uint32)
    bits = _hash_u32(lin, seed_u)

    # Integer threshold compare: P(drop) = threshold / 2^32 ~= p.
    threshold = jnp.uint32(min(int(round(p * 4294967296.0)), 4294967295))
    keep = bits >= threshold
    scale = jnp.float32(1.0 / (1.0 - p))
    o_ref[...] = jnp.where(keep, y * scale, jnp.float32(0.0)).astype(o_ref.dtype)


def _posenc_add_kernel(seed_ref, x_ref, pe_ref, o_ref):
    """Eval-mode / p==0 path: dropout is identity -> just x + pe."""
    o_ref[...] = (x_ref[...].astype(jnp.float32)
                  + pe_ref[...].astype(jnp.float32)).astype(o_ref.dtype)


# ---------------------------------------------------------------------------
# pe buffer construction (done once, plain JAX -- matches torch __init__)
# ---------------------------------------------------------------------------
def make_pe_table(d_model: int, max_length: int = 5000) -> jnp.ndarray:
    k = jnp.arange(max_length, dtype=jnp.float32)[:, None]                  # (L, 1)
    div_term = jnp.exp(
        jnp.arange(0, d_model, 2, dtype=jnp.float32)
        * (-(math.log(10000.0) / d_model))
    )                                                                        # (D/2,)
    pe = jnp.zeros((max_length, d_model), dtype=jnp.float32)
    pe = pe.at[:, 0::2].set(jnp.sin(k * div_term))
    pe = pe.at[:, 1::2].set(jnp.cos(k * div_term))
    return pe                                                                # (L, D)


# ---------------------------------------------------------------------------
# Layout / tiling choices
# ---------------------------------------------------------------------------
def _choose_plane_layout(S: int, D: int):
    """Factor each batch plane (S*D elements) into (R, W) with a lane-dense W."""
    N = S * D
    if D % 128 == 0:
        return S, D                      # already lane-dense
    if N % 128 == 0:
        W = 128
        while W * 2 <= 1024 and N % (W * 2) == 0:
            W *= 2                       # grow last dim up to 1024 lanes
        return N // W, W
    # TODO(synk): pad the plane to a multiple of 128 for full lane density;
    # falling back to (S, D) is correct but uses masked partial stores.
    return S, D


def _choose_tile_rows(R: int, W: int, itemsize: int,
                      max_tile_bytes: int = 2 << 20) -> int:
    """Largest row tile that (a) satisfies the (8,128) rule and (b) keeps each
    buffer <= ~2 MiB so the double-buffered {x, out, pe} set (<= 12 MiB) fits
    the default scoped-VMEM limit on v5e as well as v6e/v7x."""
    max_rows = max(1, max_tile_bytes // max(1, W * itemsize))
    if R <= max_rows:
        return R                         # whole plane fits -> single row tile
    t = (max_rows // 8) * 8
    while t >= 8:
        if R % t == 0:
            return t
        t -= 8
    return R                             # no aligned divisor -> full dim


# ---------------------------------------------------------------------------
# Wrapper
# ---------------------------------------------------------------------------
def positional_encoding_forward(x, pe_full, *, p: float = 0.1,
                                training: bool = True, seed: int = 0):
    """x: (B, S, D).  Returns dropout(x + pe[:S]) with torch semantics."""
    B, S, D = x.shape
    if not (0.0 <= p < 1.0):
        raise ValueError("dropout p must be in [0, 1) (p == 1 not supported)")

    pe = pe_full[:S, :].astype(jnp.float32)          # (S, D)

    R, W = _choose_plane_layout(S, D)                # per-batch plane factoring
    x2 = x.reshape(B, R, W)
    pe2 = pe.reshape(R, W)

    tile_r = _choose_tile_rows(R, W, jnp.dtype(x.dtype).itemsize)
    grid = (R // tile_r, B)                          # row tiles outer, batch inner
    seed_arr = jnp.array([seed], dtype=jnp.int32)

    if training and p > 0.0:
        kernel = functools.partial(_posenc_dropout_kernel, p=float(p),
                                   tile_r=tile_r, rows_per_batch=R, width=W)
    else:
        kernel = _posenc_add_kernel

    grid_spec = pltpu.PrefetchScalarGridSpec(
        num_scalar_prefetch=1,                       # seed lands in SMEM
        grid=grid,
        in_specs=[
            # x slab: batch dim squeezed out -> kernel sees (tile_r, W)
            pl.BlockSpec((None, tile_r, W), lambda r, b, seed_ref: (b, r, 0)),
            # pe tile: depends only on the row-tile index -> stays resident
            # across the inner batch axis (no re-DMA per batch element).
            pl.BlockSpec((tile_r, W),       lambda r, b, seed_ref: (r, 0)),
        ],
        out_specs=pl.BlockSpec((None, tile_r, W), lambda r, b, seed_ref: (b, r, 0)),
    )

    out2 = pl.pallas_call(
        kernel,
        out_shape=jax.ShapeDtypeStruct((B, R, W), x.dtype),
        grid_spec=grid_spec,
        compiler_params=pltpu.CompilerParams(
            # Every grid step is independent (stateless hash RNG), so both
            # axes can be sharded across v7x's two TensorCores.
            dimension_semantics=("parallel", "parallel"),
        ),
    )(seed_arr, x2, pe2)

    return out2.reshape(B, S, D)


# ---------------------------------------------------------------------------
if __name__ == "__main__":
    key = jax.random.PRNGKey(0)
    B, S, D = 2, 8, 32
    P_DROP = 0.1
    x = jax.random.normal(key, (B, S, D), dtype=jnp.float32)

    pe_full = make_pe_table(d_model=D, max_length=5000)

    # Training-mode forward (dropout active, fresh nn.Module default).
    out_train = positional_encoding_forward(x, pe_full, p=P_DROP,
                                            training=True, seed=1234)
    out_train = jax.block_until_ready(out_train)

    # Eval-mode forward (dropout = identity) -- exact check vs pure-JAX ref.
    out_eval = positional_encoding_forward(x, pe_full, p=P_DROP, training=False)
    out_eval = jax.block_until_ready(out_eval)

    ref = x + pe_full[None, :S, :]
    assert out_train.shape == (B, S, D)
    assert jnp.allclose(out_eval, ref, atol=1e-6, rtol=1e-6), "eval-path mismatch"

    # Training path: every element is either dropped (0) or (x+pe)/(1-p).
    scaled = ref / (1.0 - P_DROP)
    kept = jnp.isclose(out_train, scaled, atol=1e-5)
    dropped = out_train == 0.0
    assert bool(jnp.all(kept | dropped)), "dropout scaling mismatch"
    drop_frac = float(jnp.mean(dropped.astype(jnp.float32)))
    assert drop_frac <= 0.5, f"implausible drop fraction {drop_frac}"

    print("KERNEL_OK")
</pallas_src>

<mosaic_0001>
module attributes {stable_mosaic.version = 11 : i64} {
  func.func @_posenc_dropout_kernel(%arg0: i32, %arg1: i32, %arg2: memref<1xi32, #tpu.memory_space<smem>>, %arg3: memref<1x1x256xf32, #tpu.memory_space<vmem>>, %arg4: memref<1x256xf32, #tpu.memory_space<vmem>>, %arg5: memref<1x1x256xf32, #tpu.memory_space<vmem>>) attributes {dimension_semantics = [#tpu.dimension_semantics<parallel>, #tpu.dimension_semantics<parallel>], iteration_bounds = array<i64: 1, 2>, scalar_prefetch = 1 : i64, scratch_operands = 0 : i64, tpu.core_type = #tpu.core_type<tc>, window_params = [{transform_indices = @transform_0, window_bounds = array<i64: 1, 1, 256>}, {transform_indices = @transform_1, window_bounds = array<i64: 1, 256>}, {transform_indices = @transform_2, window_bounds = array<i64: 1, 1, 256>}]} {
    %c0 = arith.constant 0 : index
    %c0_0 = arith.constant 0 : index
    %c0_1 = arith.constant 0 : index
    %0 = vector.load %arg3[%c0, %c0_0, %c0_1] : memref<1x1x256xf32, #tpu.memory_space<vmem>>, vector<1x1x256xf32>
    %1 = vector.shape_cast %0 : vector<1x1x256xf32> to vector<1x256xf32>
    %c0_2 = arith.constant 0 : index
    %c0_3 = arith.constant 0 : index
    %2 = vector.load %arg4[%c0_2, %c0_3] : memref<1x256xf32, #tpu.memory_space<vmem>>, vector<1x256xf32>
    %3 = arith.addf %1, %2 : vector<1x256xf32>
    %4 = tpu.iota {dimensions = array<i32: 0>} : vector<1x256xi32>
    %5 = tpu.iota {dimensions = array<i32: 1>} : vector<1x256xi32>
    %c1_i32 = arith.constant 1 : i32
    %6 = arith.muli %c1_i32, %arg1 : i32
    %c1_i32_4 = arith.constant 1 : i32
    %7 = arith.muli %c1_i32_4, %arg0 : i32
    %8 = arith.addi %6, %7 : i32
    %9 = vector.broadcast %8 : i32 to vector<1x256xi32>
    %10 = arith.addi %9, %4 : vector<1x256xi32>
    %c256_i32 = arith.constant 256 : i32
    %11 = vector.broadcast %c256_i32 : i32 to vector<1x256xi32>
    %12 = arith.muli %10, %11 : vector<1x256xi32>
    %13 = arith.addi %12, %5 : vector<1x256xi32>
    %c0_5 = arith.constant 0 : index
    %14 = memref.load %arg2[%c0_5] : memref<1xi32, #tpu.memory_space<smem>>
    %c-1640531527_i32 = arith.constant -1640531527 : i32
    %15 = arith.muli %14, %c-1640531527_i32 : i32
    %16 = vector.broadcast %15 : i32 to vector<1x256xi32>
    %17 = arith.xori %13, %16 : vector<1x256xi32>
    %c16_i32 = arith.constant 16 : i32
    %18 = vector.broadcast %c16_i32 : i32 to vector<1x256xi32>
    %19 = arith.shrui %17, %18 : vector<1x256xi32>
    %20 = arith.xori %17, %19 : vector<1x256xi32>
    %c2146121005_i32 = arith.constant 2146121005 : i32
    %21 = vector.broadcast %c2146121005_i32 : i32 to vector<1x256xi32>
    %22 = arith.muli %20, %21 : vector<1x256xi32>
    %c15_i32 = arith.constant 15 : i32
    %23 = vector.broadcast %c15_i32 : i32 to vector<1x256xi32>
    %24 = arith.shrui %22, %23 : vector<1x256xi32>
    %25 = arith.xori %22, %24 : vector<1x256xi32>
    %c-2073254261_i32 = arith.constant -2073254261 : i32
    %26 = vector.broadcast %c-2073254261_i32 : i32 to vector<1x256xi32>
    %27 = arith.muli %25, %26 : vector<1x256xi32>
    %c16_i32_6 = arith.constant 16 : i32
    %28 = vector.broadcast %c16_i32_6 : i32 to vector<1x256xi32>
    %29 = arith.shrui %27, %28 : vector<1x256xi32>
    %30 = arith.xori %27, %29 : vector<1x256xi32>
    %c429496730_i32 = arith.constant 429496730 : i32
    %31 = vector.broadcast %c429496730_i32 : i32 to vector<1x256xi32>
    %32 = arith.cmpi uge, %30, %31 : vector<1x256xi32>
    %cst = arith.constant 1.11111116 : f32
    %33 = vector.broadcast %cst : f32 to vector<1x256xf32>
    %34 = arith.mulf %3, %33 : vector<1x256xf32>
    %cst_7 = arith.constant 0.000000e+00 : f32
    %35 = vector.broadcast %cst_7 : f32 to vector<1x256xf32>
    %36 = arith.select %32, %34, %35 : vector<1x256xi1>, vector<1x256xf32>
    %c0_8 = arith.constant 0 : index
    %c0_9 = arith.constant 0 : index
    %c0_10 = arith.constant 0 : index
    %37 = vector.load %arg5[%c0_8, %c0_9, %c0_10] : memref<1x1x256xf32, #tpu.memory_space<vmem>>, vector<1x1x256xf32>
    %38 = vector.shape_cast %37 : vector<1x1x256xf32> to vector<1x256xf32>
    %39 = vector.shape_cast %36 : vector<1x256xf32> to vector<1x1x256xf32>
    tpu.vector_store %arg5[%c0_8, %c0_9, %c0_10], %39 {strides = array<i32>} : memref<1x1x256xf32, #tpu.memory_space<vmem>>, vector<1x1x256xf32>,
    return
  }
  func.func @transform_0(%arg0: i32, %arg1: i32, %arg2: memref<1xi32, #tpu.memory_space<smem>>) -> (i32, i32, i32) {
    %c0_i32 = arith.constant 0 : i32
    %c0_i32_0 = arith.constant 0 : i32
    return %arg1, %arg0, %c0_i32 : i32, i32, i32
  }
  func.func @transform_1(%arg0: i32, %arg1: i32, %arg2: memref<1xi32, #tpu.memory_space<smem>>) -> (i32, i32) {
    %c0_i32 = arith.constant 0 : i32
    %c0_i32_0 = arith.constant 0 : i32
    return %arg0, %c0_i32 : i32, i32
  }
  func.func @transform_2(%arg0: i32, %arg1: i32, %arg2: memref<1xi32, #tpu.memory_space<smem>>) -> (i32, i32, i32) {
    %c0_i32 = arith.constant 0 : i32
    %c0_i32_0 = arith.constant 0 : i32
    return %arg1, %arg0, %c0_i32 : i32, i32, i32
  }
}

</mosaic_0001>

<bundles_post_ra>
// kernel: tpu_custom_call.1
= control target key start
LH: loop header
LB: loop body
LE: loop exit
PB: predicated region body
PF: predicated region fallthrough
CT: control target
= control target key end

     0   :  { %s716_s0 = inlined_call_operand.<no memory space> [shape: s32[1], index: 0, kind: input, shape index: {}]   ;;  %s717_s1 = inlined_call_operand.hbm [shape: f32[2,1,256], index: 1, kind: input, shape index: {}]   ;;  %s718_s2 = inlined_call_operand.vmem [shape: f32[1,256], index: 2, kind: input, shape index: {}]   ;;  %s719_s3 = inlined_call_operand.hbm [shape: f32[2,1,256], index: 3, kind: output, shape index: {}]  }
   0x1   :  { %8 = sst [smem:[#allocation3]] %s716_s0 }
   0x2   :  { %9 = vsyncpa [#allocation5], 0 }
   0x3   :  { %11 = vsyncpa [#allocation5 + $0x1], 0 }
   0x4   :  { %12 = vsyncpa [#allocation6], 0 }
   0x5   :  { %14 = vsyncpa [#allocation6 + $0x1], 0  ;;  %s588_s14 = smov 0   ;;  %s590_s15 = smov 0  }
   0x6   :  { %s592_s16 = smov 0   ;;  %s594_s17 = smov 0  }
   0x7   :  { %s596_s18 = smov 0   ;;  %s598_s19 = smov 0  }
   0x8 LB: > { %s373_s0 = sadd.s32 4294967295, %s563_s19   ;;  %s374_s20 = sadd.s32 4294967294, %s563_s19   ;;  %s563_s19 = sphi %s598_s19, %s20_s19   ;;  %s559_s18 = sphi %s596_s18, %s728_s18   ;;  %s555_s17 = sphi %s594_s17, %s727_s17   ;;  %s551_s16 = sphi %s592_s16, %s726_s16   ;;  %s547_s15 = sphi %s590_s15, %s725_s15   ;;  %s543_s14 = sphi %s588_s14, %s724_s14  }
   0x9   : > { %s29_s21 = sadd.s32 1, %s559_s18  ;;  %s41_s22 = sadd.s32 1, %s551_s16 }
   0xa   : > { %p30_p0 = scmp.ge.s32.totalorder %s29_s21, 2  ;;  %p48_p1 = scmp.ne.s32.totalorder %s551_s16, %s547_s15 }
   0xb   : > { %p49_p2 = scmp.eq.s32.totalorder %s563_s19, 0  ;;  %p54_p3 = scmp.ne.s32.totalorder %s547_s15, %s543_s14 }
   0xc   : > { %s730_s21 = smov (%p30_p0, %s29_s21), 0  ;;  %p55_p5 = scmp.eq.s32.totalorder %s373_s0, 0 }
   0xd   : > { %p629_p4 = por %p49_p2, %p48_p1  ;;  %s36_s24 = ssub.s32 %s559_s18, %s730_s21 }
   0xe   : > { %p106_p6 = scmp.eq.s32.totalorder %s373_s0, 1  ;;  %p39_p7 = scmp.eq.s32.totalorder %s36_s24, 0 }
   0xf   : > { %p635_p8 = por %p55_p5, %p54_p3  ;;  %p112_p10 = scmp.eq.s32.totalorder %s374_s20, 1 }
  0x10   : > { %p639_p9 = por %p106_p6, %p48_p1  ;;  %p377_p12 = scmp.ge.s32.totalorder %s563_s19, 2 }
  0x11   : > { %s644_s27 = scalar_select %p39_p7, %s551_s16, %s41_s22  }
  0x12   : > { %p646_p11 = por %p112_p10, %p54_p3  ;;  %p401_p13 = scmp.lt.s32.totalorder %s563_s19, 2 }
  0x13   : > { %s139_s29 = sand.u32 1, %s551_s16   ;;  %s379_s4 = sshll.u32 %s559_s18, 1 }
  0x14   : > { %s378_s30 = sshll.u32 %s139_s29, 1  ;;  %s149_s7 = scalar_lea.hbm %s717_s1, %s379_s4 }
  0x15   : > { %s143_s8 = scalar_lea.vmem [#allocation4], %s378_s30  ;;  %s151_s10 = sshll.u32 %s149_s7, 4  ;;  %s152_s10 = int_to_ptr.hbm [resolvable:$true] %s151_s10 }
  0x16   : > { %s153_s9 = sshll.u32 %s143_s8, 4  ;;  %p394_p0 = pnand %p401_p13, %p629_p4  ;;  %s154_s9 = int_to_ptr.vmem [resolvable:$true] %s153_s9 }
  0x17   : > { %p380_p1 = scmp.ge.s32.totalorder %s563_s19, 1  ;;  %p158_p2 = scmp.lt.s32.totalorder %s563_s19, 3 }
  0x18   : > { %s140_s11 = scalar_lea.sflag [#allocation5], %s139_s29 }
  0x19   : > { %396 = dma.hbm_to_vmem [thread:$0]  (!%p394_p0), %s152_s10, 32, %s154_s9, %s140_s11  }
  0x1a   : > { %p159_p3 = pnand %p380_p1, %p158_p2 }
  0x1b   : > { %s662_s12 = sand.u32 (!%p159_p3), 1, %s547_s15  }
  0x1c   : > { %162 = sbr.rel (%p159_p3) target bundleno = 72 (0x48), region = 28  ;;  %s381_s13 = sshll.u32 (!%p159_p3), %s662_s12, 1 }
  0x1d   : > { %s165_s0 = scalar_lea.sflag (!%p159_p3), [#allocation5], %s662_s12  ;;  %s168_s20 = scalar_lea.vmem (!%p159_p3), [#allocation4], %s381_s13 }
  0x21   : > { %534 = dma.done.wait (%p635_p8), %s165_s0, 32  }
  0x22   : > { %536 = vsyncadd (%p635_p8), %s165_s0, 4294967264  ;;  %v201_v0 = vlaneseq  ;;  %s212_s22 = sld [smem:[#allocation3]]  ;;  %v207_v1 = vstv %s555_s17  ;;  %v198_v16 = vld [vmem:[%s168_s20] sm:$0x3]  ;;  %s386_s29 = sshll.u32 %s555_s17, 1  ;;  %vm250_vm2 = vcmask 1040384  }
  0x23   : > { %v199_v17 = vld [vmem:[%s718_s2] sm:$0x3]  ;;  %s271_s5 = scalar_lea.hbm %s719_s3, %s386_s29  ;;  %s193_s6 = scalar_lea.vmem [#allocation7], %s381_s13 }
  0x24   : > { %v202_v2 = vshrl.u32 %v201_v0, 7  ;;  %v204_v3 = vand.u32 127, %v201_v0  ;;  %v200_v22 = vadd.f32 %v199_v17, %v198_v16  ;;  %s273_s7 = sshll.u32 %s193_s6, 4  ;;  %s275_s8 = sshll.u32 %s271_s5, 4  ;;  %vm255_vm3 = vcmp.lt.s32.totalorder %v201_v0, 256  ;;  %s274_s7 = int_to_ptr.vmem [resolvable:$true] %s273_s7  ;;  %s276_s8 = int_to_ptr.hbm [resolvable:$true] %s275_s8 }
  0x25   : > { %s259_s17 = scalar_lea.sflag [#allocation6], %s662_s12  ;;  %s495_s9 = sshra.s32 %s276_s8, 4  ;;  %s496_s9 = int_to_ptr.hbm [resolvable:$true] %s495_s9 }
  0x26   : > { %v205_v4 = vadd.s32 128, %v204_v3  ;;  %v208_v5 = vadd.s32 %v207_v1, %v202_v2  ;;  %v239_v27 = vmul.f32 1.1111112, %v200_v22  ;;  %s497_s10 = scalar_lea.hbm %s496_s9, 2  ;;  %s501_s0 = scalar_lea.hbm %s719_s3, 4 }
  0x27   : > { %p498_p4 = scmp.ne.s32.totalorder %s496_s9, %s497_s10  ;;  %p502_p7 = scmp.lt.s32.totalorder %s496_s9, %s719_s3 }
  0x28   : > { %v209_v6 = vmul.u32 256, %v208_v5  ;;  %s213_s23 = smul.u32 2654435769, %s212_s22  ;;  %v241_v32 = vperm.slane %v239_v27, 0  ;;  %v242_v33 = vperm.slane %v239_v27, 1  ;;  %p503_p8 = scmp.lt.s32.totalorder %s501_s0, %s497_s10 }
  0x29   : > { %p499_p5 = pnand %p498_p4, %p639_p9 }
  0x2a   : > { %v210_v7 = vadd.s32 %v209_v6, %v204_v3  ;;  %v211_v8 = vadd.s32 %v209_v6, %v205_v4  ;;  %v214_v9 = vstv %s213_s23  ;;  %p504_p10 = por %p503_p8, %p502_p7 }
  0x2b   : > { %p500_p6 = pneg %p499_p5 }
  0x2c   : > { %v215_v10 = vxor.u32 %v214_v9, %v210_v7  ;;  %v216_v11 = vxor.u32 %v214_v9, %v211_v8 }
  0x2d   : > { %p505_p13 = pnand %p504_p10, %p500_p6 }
  0x2e   : > { %v217_v12 = vshrl.u32 %v215_v10, 16  ;;  %v218_v13 = vshrl.u32 %v216_v11, 16 }
  0x30   : > { %v219_v14 = vxor.u32 %v217_v12, %v215_v10  ;;  %v220_v15 = vxor.u32 %v218_v13, %v216_v11 }
  0x32   : > { %v221_v18 = vmul.u32 2146121005, %v219_v14  ;;  %v222_v19 = vmul.u32 2146121005, %v220_v15 }
  0x34   : > { %v223_v20 = vshrl.u32 %v221_v18, 15  ;;  %v224_v21 = vshrl.u32 %v222_v19, 15 }
  0x36   : > { %v225_v23 = vxor.u32 %v223_v20, %v221_v18  ;;  %v226_v24 = vxor.u32 %v224_v21, %v222_v19 }
  0x38   : > { %v227_v25 = vmul.u32 2221713035, %v225_v23  ;;  %v228_v26 = vmul.u32 2221713035, %v226_v24 }
  0x3a   : > { %v229_v28 = vshrl.u32 %v227_v25, 16  ;;  %v230_v29 = vshrl.u32 %v228_v26, 16 }
  0x3c   : > { %v231_v30 = vxor.u32 %v229_v28, %v227_v25  ;;  %v232_v31 = vxor.u32 %v230_v29, %v228_v26 }
  0x3e   : > { %v383_v34 = vxor.u32 2147483648, %v231_v30  ;;  %v384_v35 = vxor.u32 2147483648, %v232_v31 }
  0x40   : > { %vm235_vm0 = vcmp.ge.s32.totalorder %v383_v34, 2576980378  ;;  %vm238_vm1 = vcmp.ge.s32.totalorder %v384_v35, 2576980378 }
  0x41   : > { %v245_v36 = vsel %vm235_vm0, %v241_v32, 0.0  ;;  %v246_v37 = vsel %vm238_vm1, %v242_v33, 0.0 }
  0x42   : > { %v249_v38 = vrot.slane %v246_v37, 7 }
  0x44   : > { %v251_v39 = vsel %vm250_vm2, %v245_v36, %v249_v38 }
  0x45   : > { %257 = vst.msk [vmem:[%s193_s6] sm:$0x3] %vm255_vm3, %v251_v39 }
  0x46   : > { %508 = shalt.err (!%p505_p13)
}
  0x47   : > { %391 = dma.vmem_to_hbm [thread:$0]  (%p639_p9), %s274_s7, 32, %s276_s8, %s259_s17  }
  0x48 PF: > { %s287_s12 = sand.u32 1, %s543_s14   ;;  %p398_p0 = pnand %p377_p12, %p646_p11 }
  0x49   : > { %s288_s23 = scalar_lea.sflag [#allocation6], %s287_s12 }
  0x4a   : > { %p399_p1 = pneg %p398_p0 }
  0x4c   : > { %538 = dma.done.wait (%p399_p1), %s288_s23, 32  }
  0x4d   : > { %540 = vsyncadd (%p399_p1), %s288_s23, 4294967264  ;;  %s20_s19 = sadd.s32 1, %s563_s19   ;;  %s724_s14 = smov %s547_s15 }
  0x4e   : > { %p17_p2 = scmp.ge.s32.totalorder %s20_s19, 4   ;;  %s725_s15 = smov %s551_s16 }
  0x4f   : > { %s726_s16 = smov %s644_s27  ;;  %s727_s17 = smov %s559_s18 }
  0x50   : > { %s728_s18 = smov %s730_s21  ;;  %19 = sbr.rel (!%p17_p2) target bundleno = 8 (0x8), region = 76 }
  0x55   :  { %294 = vsyncpa [#allocation5], 1 }
  0x56   :  { %296 = vsyncpa [#allocation5 + $0x1], 1 }
  0x57   :  { %297 = vsyncpa [#allocation6], 1 }
  0x58   :  { %299 = vsyncpa [#allocation6 + $0x1], 1 }

</bundles_post_ra>
